<compile_context>
chip_gen: v7x
topology: tpu7x:2x2x1
jax: 0.10.0
libtpu: 0.0.40
codegen_flags: <defaults>
</compile_context>

<pallas_src>
from functools import partial

import jax
import jax.numpy as jnp
from jax.experimental import pallas as pl
from jax.experimental.pallas import tpu as pltpu

_TILE_BYTES = 2 * 1024 * 1024        # ~2 MiB (f32-equivalent) per block
_VMEM_LIMIT = 32 * 1024 * 1024       # safe on v5e (128M), v6e (128M), v7x (64M)


def _ssq_kernel(x_ref, inv_ref, acc_ref, *, count, total_rows, block_rows,
                mask_tail):
    """Pass 1: VPU-accumulate sum(x^2); emit rsqrt(sum/count) on last step."""
    i = pl.program_id(0)

    x = x_ref[...].astype(jnp.float32)
    x2 = x * x
    if mask_tail:
        # Ragged last block: rows beyond the array are unspecified -> mask.
        row = (jax.lax.broadcasted_iota(jnp.int32, x2.shape, 0)
               + i * block_rows)
        x2 = jnp.where(row < total_rows, x2, 0.0)

    @pl.when(i == 0)
    def _():
        acc_ref[...] = jnp.zeros_like(acc_ref)

    acc_ref[...] += x2                      # element-wise, stays on the VPU

    @pl.when(i == pl.num_programs(0) - 1)
    def _():
        ssq = jnp.sum(acc_ref[...])         # single cross-lane reduce
        inv = jax.lax.rsqrt(ssq / jnp.float32(count))
        inv_ref[...] = jnp.full((1, 1), inv, dtype=jnp.float32)


def _scale_kernel(inv_ref, x_ref, o_ref):
    """Pass 2: out = x * rsqrt(energy); scalar comes from SMEM."""
    inv = inv_ref[0]
    o_ref[...] = (x_ref[...].astype(jnp.float32) * inv).astype(o_ref.dtype)


def entropy_normalization(x):
    """Pallas implementation of EntropyNormalization.forward for NCHW input."""
    orig_shape = x.shape
    orig_dtype = x.dtype
    channels = orig_shape[1]
    # (x**2).sum(axis=1) has numel/C elements; .mean() divides by that count.
    count = x.size // channels
    n = x.size

    # ---- choose a lane-dense 2-D view (no padding on the main path) ----
    width = None
    for w in (4096, 2048, 1024, 512, 256, 128):
        if n % w == 0:
            width = w
            break

    if width is not None:
        slab = x.reshape(-1, width)          # free reshape, no HBM copy
        pad_tail = 0
    else:
        # Rare fallback: total element count not a multiple of 128.
        width = 128
        padded_n = ((n + width - 1) // width) * width
        pad_tail = padded_n - n
        slab = jnp.pad(x.reshape(-1), (0, pad_tail)).reshape(-1, width)

    rows = slab.shape[0]

    # ~2 MiB blocks sit at the HBM-roofline plateau while double-buffered
    # in+out (pass 2) stays < 16 MiB. Sublane count multiple of 32 keeps
    # f32 / bf16 / int8 vreg packing dense.
    target_rows = max(32, ((_TILE_BYTES // 4) // width) // 32 * 32)
    if rows <= target_rows:
        block_rows = rows                    # full dim -> exempt from (8,128)
        n_tiles = 1
    else:
        block_rows = target_rows
        n_tiles = pl.cdiv(rows, block_rows)
    mask_tail = (rows % block_rows) != 0

    grid = (n_tiles,)
    x_spec = pl.BlockSpec((block_rows, width), lambda i: (i, 0))

    # ---- Pass 1: inv = rsqrt( sum(x^2) / count ) -> (1,1) scalar ----
    inv = pl.pallas_call(
        partial(_ssq_kernel, count=count, total_rows=rows,
                block_rows=block_rows, mask_tail=mask_tail),
        out_shape=jax.ShapeDtypeStruct((1, 1), jnp.float32),
        grid=grid,
        in_specs=[x_spec],
        out_specs=pl.BlockSpec((1, 1), lambda i: (0, 0)),
        scratch_shapes=[pltpu.VMEM((block_rows, width), jnp.float32)],
        compiler_params=pltpu.CompilerParams(
            dimension_semantics=("arbitrary",),
            vmem_limit_bytes=_VMEM_LIMIT),
    )(slab)

    # ---- Pass 2: out = x * inv (scalar delivered via SMEM) ----
    out_slab = pl.pallas_call(
        _scale_kernel,
        out_shape=jax.ShapeDtypeStruct(slab.shape, orig_dtype),
        grid=grid,
        in_specs=[pl.BlockSpec(memory_space=pltpu.MemorySpace.SMEM),
                  x_spec],
        out_specs=x_spec,
        compiler_params=pltpu.CompilerParams(
            dimension_semantics=("parallel",),
            vmem_limit_bytes=_VMEM_LIMIT),
    )(inv.reshape((1,)), slab)

    if pad_tail:
        return out_slab.reshape(-1)[:n].reshape(orig_shape)
    return out_slab.reshape(orig_shape)


def _reference(x):
    energy = jnp.mean(jnp.sum(x.astype(jnp.float32) ** 2, axis=1))
    return (x / jnp.sqrt(energy)).astype(x.dtype)


if __name__ == "__main__":
    key = jax.random.PRNGKey(0)
    x = jax.random.normal(key, (2, 4, 16, 16), dtype=jnp.float32)  # NCHW

    out = jax.block_until_ready(entropy_normalization(x))

    ref = _reference(x)
    assert out.shape == x.shape and out.dtype == x.dtype
    assert jnp.allclose(out, ref, rtol=1e-5, atol=1e-5), "mismatch vs reference"
    print("KERNEL_OK")
</pallas_src>

<mosaic_0001>
module attributes {stable_mosaic.version = 11 : i64} {
  func.func @_ssq_kernel(%arg0: i32, %arg1: memref<1x2048xf32, #tpu.memory_space<vmem>>, %arg2: memref<1x1xf32, #tpu.memory_space<vmem>>, %arg3: memref<1x2048xf32, #tpu.memory_space<vmem>>) attributes {dimension_semantics = [#tpu.dimension_semantics<arbitrary>], iteration_bounds = array<i64: 1>, scalar_prefetch = 0 : i64, scratch_operands = 1 : i64, tpu.core_type = #tpu.core_type<tc>, window_params = [{transform_indices = @transform_0, window_bounds = array<i64: 1, 2048>}, {pipeline_mode = #tpu.pipeline_mode<synchronous>, transform_indices = @transform_1, window_bounds = array<i64: 1, 1>}]} {
    %c0 = arith.constant 0 : index
    %c0_0 = arith.constant 0 : index
    %0 = vector.load %arg1[%c0, %c0_0] : memref<1x2048xf32, #tpu.memory_space<vmem>>, vector<1x2048xf32>
    %1 = arith.mulf %0, %0 : vector<1x2048xf32>
    %c0_i32 = arith.constant 0 : i32
    %2 = arith.cmpi eq, %arg0, %c0_i32 : i32
    %3 = arith.extui %2 : i1 to i32
    %c0_i32_1 = arith.constant 0 : i32
    %4 = arith.cmpi ne, %3, %c0_i32_1 : i32
    scf.if %4 {
      %cst = arith.constant 0.000000e+00 : f32
      %11 = vector.broadcast %cst : f32 to vector<1x2048xf32>
      %c0_8 = arith.constant 0 : index
      %c0_9 = arith.constant 0 : index
      %12 = vector.load %arg3[%c0_8, %c0_9] : memref<1x2048xf32, #tpu.memory_space<vmem>>, vector<1x2048xf32>
      tpu.vector_store %arg3[%c0_8, %c0_9], %11 {strides = array<i32>} : memref<1x2048xf32, #tpu.memory_space<vmem>>, vector<1x2048xf32>,
    } else {
    }
    %c0_2 = arith.constant 0 : index
    %c0_3 = arith.constant 0 : index
    %5 = vector.load %arg3[%c0_2, %c0_3] : memref<1x2048xf32, #tpu.memory_space<vmem>>, vector<1x2048xf32>
    %6 = arith.addf %5, %1 : vector<1x2048xf32>
    %c0_4 = arith.constant 0 : index
    %c0_5 = arith.constant 0 : index
    %7 = vector.load %arg3[%c0_4, %c0_5] : memref<1x2048xf32, #tpu.memory_space<vmem>>, vector<1x2048xf32>
    tpu.vector_store %arg3[%c0_4, %c0_5], %6 {strides = array<i32>} : memref<1x2048xf32, #tpu.memory_space<vmem>>, vector<1x2048xf32>,
    %c0_i32_6 = arith.constant 0 : i32
    %8 = arith.cmpi eq, %arg0, %c0_i32_6 : i32
    %9 = arith.extui %8 : i1 to i32
    %c0_i32_7 = arith.constant 0 : i32
    %10 = arith.cmpi ne, %9, %c0_i32_7 : i32
    scf.if %10 {
      %c0_8 = arith.constant 0 : index
      %c0_9 = arith.constant 0 : index
      %11 = vector.load %arg3[%c0_8, %c0_9] : memref<1x2048xf32, #tpu.memory_space<vmem>>, vector<1x2048xf32>
      %12 = vector.shape_cast %11 : vector<1x2048xf32> to vector<1x1x2048xf32>
      %cst = arith.constant dense<0.000000e+00> : vector<1xf32>
      %13 = vector.multi_reduction <add>, %12, %cst [1, 2] : vector<1x1x2048xf32> to vector<1xf32>
      %14 = vector.shape_cast %13 : vector<1xf32> to vector<1x1x1xf32>
      %15 = vector.extract %14[0, 0, 0] : f32 from vector<1x1x1xf32>
      %cst_10 = arith.constant 5.120000e+02 : f32
      %16 = arith.divf %15, %cst_10 : f32
      %17 = math.rsqrt %16 : f32
      %18 = vector.broadcast %17 : f32 to vector<1x1xf32>
      %c0_11 = arith.constant 0 : index
      %c0_12 = arith.constant 0 : index
      %19 = vector.load %arg2[%c0_11, %c0_12] : memref<1x1xf32, #tpu.memory_space<vmem>>, vector<1x1xf32>
      tpu.vector_store %arg2[%c0_11, %c0_12], %18 {strides = array<i32>} : memref<1x1xf32, #tpu.memory_space<vmem>>, vector<1x1xf32>,
    } else {
    }
    return
  }
  func.func @transform_0(%arg0: i32) -> (i32, i32) {
    %c0_i32 = arith.constant 0 : i32
    %c0_i32_0 = arith.constant 0 : i32
    return %arg0, %c0_i32 : i32, i32
  }
  func.func @transform_1(%arg0: i32) -> (i32, i32) {
    %c0_i32 = arith.constant 0 : i32
    %c0_i32_0 = arith.constant 0 : i32
    %c0_i32_1 = arith.constant 0 : i32
    return %c0_i32, %c0_i32_0 : i32, i32
  }
}

</mosaic_0001>

<bundles_post_ra>
// kernel: tpu_custom_call.1
= control target key start
LH: loop header
LB: loop body
LE: loop exit
PB: predicated region body
PF: predicated region fallthrough
CT: control target
= control target key end

     0   :  { %6 = vsyncpa [#allocation4], 0  ;;  %s297_s0 = inlined_call_operand.hbm [shape: f32[1,2048], index: 0, kind: input, shape index: {}]   ;;  %s298_s1 = inlined_call_operand.hbm [shape: f32[1,1], index: 1, kind: output, shape index: {}]  }
   0x1   :  { %7 = vsyncpa [#allocation5], 0  ;;  %s245_s6 = smov [#allocation3]   ;;  %s197_s10 = scalar_lea.hbm %s297_s0, 256 }
   0x2   :  { %s14_s7 = sshll.u32 %s245_s6, 4  ;;  %p198_p0 = scmp.ne.s32.totalorder %s297_s0, %s197_s10  ;;  %s15_s7 = int_to_ptr.vmem [resolvable:$true] %s14_s7 }
   0x3   :  { %p201_p1 = scmp.lt.u32.totalorder %s197_s10, %s297_s0 }
   0x5   :  { %p203_p2 = pnand %p201_p1, %p198_p0 }
   0x7   :  { %206 = shalt.err (!%p203_p2)
}
   0x8   :  { %s207_s15 = scalar_lea.vmem %s15_s7, 256  ;;  %p212_p4 = scmp.lt.s32.totalorder %s15_s7, %s15_s7 }
   0x9   :  { %p208_p3 = scmp.ne.s32.totalorder %s15_s7, %s207_s15  ;;  %p213_p5 = scmp.lt.s32.totalorder %s207_s15, %s207_s15 }
   0xb   :  { %p214_p6 = por %p213_p5, %p212_p4 }
   0xd   :  { %p215_p7 = pnand %p214_p6, %p208_p3 }
   0xf   :  { %218 = shalt.err (!%p215_p7)
}
  0x10   :  { %17 = dma.hbm_to_vmem [thread:$0]  %s297_s0, 256, %s15_s7, [#allocation4]  }
  0x11   :  { %241 = dma.done.wait [#allocation4], 256  }
  0x12   :  { %242 = vsyncadd [#allocation4], 4294967040  ;;  %v44_v0 = vlaneseq  ;;  %v21_v5 = vld [vmem:[#allocation3] sm:$0xff]  ;;  %vm124_vm0 = vcmask 1040384   ;;  %v22_v19 = vld [vmem:[#allocation3 + $0x8] sm:$0xff]  ;;  %s246_s19 = smov [#allocation6]  }
  0x13   :  { %v23_v6 = vmul.f32 %v21_v5, %v21_v5  ;;  %v24_v25 = vmul.f32 %v22_v19, %v22_v19  ;;  %s180_s20 = sshll.u32 %s246_s19, 4  ;;  %vm172_vm1 = vcmask 0   ;;  %s181_s20 = int_to_ptr.vmem [resolvable:$true] %s180_s20 }
  0x14   :  { %v45_v1 = vshrl.u32 %v44_v0, 7  ;;  %s219_s22 = scalar_lea.vmem %s181_s20, 16  ;;  %s223_s23 = scalar_lea.vmem %s181_s20, 32 }
  0x15   :  { %p220_p8 = scmp.ne.s32.totalorder %s181_s20, %s219_s22  ;;  %p224_p9 = scmp.lt.s32.totalorder %s181_s20, %s181_s20 }
  0x16   :  { %v46_v2 = vsub.s32 0, %v45_v1  ;;  %v50_v3 = vsub.s32 1, %v45_v1  ;;  %v54_v4 = vsub.s32 2, %v45_v1  ;;  %v58_v7 = vsub.s32 3, %v45_v1  ;;  %p225_p10 = scmp.lt.s32.totalorder %s223_s23, %s219_s22 }
  0x17   :  { %v62_v11 = vsub.s32 4, %v45_v1  ;;  %v66_v13 = vsub.s32 5, %v45_v1  ;;  %v70_v14 = vsub.s32 6, %v45_v1  ;;  %v74_v22 = vsub.s32 7, %v45_v1 }
  0x18   :  { %v47_v8 = vrot.slane %v23_v6, %v46_v2  ;;  %v51_v9 = vrot.slane %v23_v6, %v50_v3  ;;  %v55_v10 = vrot.slane %v23_v6, %v54_v4  ;;  %v59_v12 = vrot.slane %v23_v6, %v58_v7  ;;  %p226_p11 = por %p225_p10, %p224_p9 }
  0x19   :  { %v63_v15 = vrot.slane %v23_v6, %v62_v11  ;;  %v67_v21 = vrot.slane %v23_v6, %v66_v13  ;;  %v71_v26 = vrot.slane %v23_v6, %v70_v14  ;;  %v75_v29 = vrot.slane %v23_v6, %v74_v22 }
  0x1a   :  { %v125_v16 = vsel %vm124_vm0, %v47_v8, 0.0  ;;  %v126_v17 = vsel %vm124_vm0, %v51_v9, 0.0  ;;  %v128_v18 = vsel %vm124_vm0, %v55_v10, 0.0  ;;  %v130_v23 = vsel %vm124_vm0, %v59_v12, 0.0  ;;  %p227_p12 = pnand %p226_p11, %p220_p8 }
  0x1b   :  { %v127_v20 = vadd.f32 %v126_v17, %v125_v16  ;;  %v132_v27 = vsel %vm124_vm0, %v63_v15, 0.0  ;;  %v134_v30 = vsel %vm124_vm0, %v67_v21, 0.0  ;;  %v79_v32 = vrot.slane %v24_v25, %v46_v2 }
  0x1c   :  { %v136_v33 = vsel %vm124_vm0, %v71_v26, 0.0  ;;  %v83_v35 = vrot.slane %v24_v25, %v50_v3  ;;  %v138_v36 = vsel %vm124_vm0, %v75_v29, 0.0  ;;  %v87_v38 = vrot.slane %v24_v25, %v54_v4 }
  0x1d   :  { %v129_v24 = vadd.f32 %v128_v18, %v127_v20  ;;  %v140_v39 = vsel %vm124_vm0, %v79_v32, 0.0  ;;  %v91_v41 = vrot.slane %v24_v25, %v58_v7  ;;  %v95_v44 = vrot.slane %v24_v25, %v62_v11 }
  0x1e   :  { %v142_v42 = vsel %vm124_vm0, %v83_v35, 0.0  ;;  %v144_v45 = vsel %vm124_vm0, %v87_v38, 0.0  ;;  %v99_v47 = vrot.slane %v24_v25, %v66_v13  ;;  %v103_v50 = vrot.slane %v24_v25, %v70_v14 }
  0x1f   :  { %v131_v28 = vadd.f32 %v130_v23, %v129_v24  ;;  %v146_v48 = vsel %vm124_vm0, %v91_v41, 0.0  ;;  %v148_v51 = vsel %vm124_vm0, %v95_v44, 0.0  ;;  %v107_v53 = vrot.slane %v24_v25, %v74_v22 }
  0x20   :  { %v150_v54 = vsel %vm124_vm0, %v99_v47, 0.0  ;;  %v152_v56 = vsel %vm124_vm0, %v103_v50, 0.0 }
  0x21   :  { %v133_v31 = vadd.f32 %v132_v27, %v131_v28  ;;  %v154_v58 = vsel %vm124_vm0, %v107_v53, 0.0 }
  0x23   :  { %v135_v34 = vadd.f32 %v134_v30, %v133_v31 }
  0x25   :  { %v137_v37 = vadd.f32 %v136_v33, %v135_v34 }
  0x27   :  { %v139_v40 = vadd.f32 %v138_v36, %v137_v37 }
  0x29   :  { %v141_v43 = vadd.f32 %v140_v39, %v139_v40 }
  0x2b   :  { %v143_v46 = vadd.f32 %v142_v42, %v141_v43 }
  0x2d   :  { %v145_v49 = vadd.f32 %v144_v45, %v143_v46 }
  0x2f   :  { %v147_v52 = vadd.f32 %v146_v48, %v145_v49 }
  0x31   :  { %v149_v55 = vadd.f32 %v148_v51, %v147_v52 }
  0x33   :  { %v151_v57 = vadd.f32 %v150_v54, %v149_v55 }
  0x35   :  { %v153_v59 = vadd.f32 %v152_v56, %v151_v57 }
  0x37   :  { %v155_v60 = vadd.f32 %v154_v58, %v153_v59 }
  0x39   :  { %156 = vadd.xlane.f32.xlu0 %v155_v60 }
  0xc6   :  { %v157_v61 = vpop.xlane.xlu0 %156 }
  0xc7   :  { %v158_v62 = vrot.slane %v157_v61, 4 }
  0xc9   :  { %v159_v63 = vadd.f32 %v158_v62, %v157_v61 }
  0xcb   :  { %v160_v0 = vrot.slane %v159_v63, 2 }
  0xcd   :  { %v161_v1 = vadd.f32 %v160_v0, %v159_v63 }
  0xcf   :  { %v162_v2 = vrot.slane %v161_v1, 1 }
  0xd1   :  { %v163_v3 = vadd.f32 %v162_v2, %v161_v1 }
  0xd3   :  { %189 = vpush %v163_v3 }
 0x104   :  { %s190_s0 = spop %189 }
 0x105   :  { %s167_s18 = smul.f32 0.001953125, %s190_s0 }
 0x107   :  { %v168_v4 = vstv %s167_s18 }
 0x108   :  { %195 = vrsqrt.f32 %v168_v4 }
 0x112   :  { %v196_v5 = vpop.eup %195 }
 0x113   :  { %191 = vpush %v196_v5 }
 0x144   :  { %s192_s21 = spop %191 }
 0x145   :  { %v171_v6 = vstv %s192_s21 }
 0x146   :  { %173 = vst.msk [vmem:[#allocation6] sm:$0x1] %vm172_vm1, %v171_v6 }
 0x147   :  { %230 = shalt.err (!%p227_p12)
}
 0x148   :  { %s231_s26 = scalar_lea.hbm %s298_s1, 16 }
 0x149   :  { %p232_p13 = scmp.ne.s32.totalorder %s298_s1, %s231_s26  ;;  %p235_p0 = scmp.lt.u32.totalorder %s231_s26, %s298_s1 }
 0x14b   :  { %p237_p1 = pnand %p235_p0, %p232_p13 }
 0x14d   :  { %240 = shalt.err (!%p237_p1)
}
 0x14e   :  { %183 = dma.vmem_to_hbm [thread:$0]  %s181_s20, 16, %s298_s1, [#allocation5]  }
 0x14f   :  { %243 = dma.done.wait [#allocation5], 16  }
 0x150   :  { %244 = vsyncadd [#allocation5], 4294967280 }
 0x151   :  { %187 = vsyncpa [#allocation4], 1 }
 0x152   :  { %188 = vsyncpa [#allocation5], 1 }

</bundles_post_ra>
